<compile_context>
chip_gen: v7x
topology: tpu7x:2x2x1
jax: 0.10.0
libtpu: 0.0.40
codegen_flags: <defaults>
</compile_context>

<pallas_src>
import functools

import jax
import jax.numpy as jnp
from jax.experimental import pallas as pl
from jax.experimental.pallas import tpu as pltpu


def _crossen_kernel(x_ref, out_ref, acc_ref, colmax_ref, colsum_ref, *, margin, n_rows):
    t = pl.program_id(0)
    n_tiles = pl.num_programs(0)

    x = x_ref[...].astype(jnp.float32)  # (TM, N) per-tile cast (bf16 inputs stay 2B in HBM)
    tm, n = x.shape

    # ---- init accumulators on the first grid step ----
    @pl.when(t == 0)
    def _():
        acc_ref[...] = jnp.zeros_like(acc_ref)
        colmax_ref[...] = jnp.full(colmax_ref.shape, -jnp.inf, dtype=jnp.float32)
        colsum_ref[...] = jnp.zeros_like(colsum_ref)

    # ---- per-tile diagonal mask (single pair of tile-shaped iotas) ----
    row_ids = jax.lax.broadcasted_iota(jnp.int32, (tm, n), 0) + t * tm  # global row ids
    col_ids = jax.lax.broadcasted_iota(jnp.int32, (tm, n), 1)
    eye = row_ids == col_ids

    # Ragged last tile: rows past n_rows are padded garbage -> push to a large negative
    # value so they cannot affect maxima / sums.  Static branch: free when TM divides N.
    ragged = (n_rows % tm) != 0
    if ragged:
        rid1 = jax.lax.broadcasted_iota(jnp.int32, (tm, 1), 0) + t * tm
        valid1 = rid1 < n_rows  # (TM, 1)
        x = jnp.where(valid1, x, jnp.float32(-1e30))

    # Margin on the diagonal (skip the N^2 select entirely for the default margin == 0).
    if margin != 0.0:
        x = jnp.where(eye, x - jnp.float32(margin), x)

    # ---- diagonal extracted once ----
    diag = jnp.sum(jnp.where(eye, x, 0.0), axis=-1, keepdims=True)  # (TM, 1)

    # ---- row-wise log-sum-exp (the only N^2 exp) ----
    row_max = jnp.max(x, axis=-1, keepdims=True)                    # (TM, 1)
    e = jnp.exp(x - row_max)                                        # (TM, N)
    row_sum = jnp.sum(e, axis=-1, keepdims=True)                    # (TM, 1)
    lse_row = row_max + jnp.log(row_sum)                            # (TM, 1)

    if ragged:
        lse_row = jnp.where(valid1, lse_row, 0.0)                   # padded rows contribute 0
    # Scalar accumulation: sum(lse_row) - 2 * sum(diag)  (diag appears in both directions).
    acc_ref[...] += jnp.sum(lse_row - 2.0 * diag, axis=0, keepdims=True)  # (1, 1)

    # ---- online column-wise sum-exp, reusing E (only O(TM + N) extra exps) ----
    g = jnp.max(row_max, axis=0, keepdims=True)                     # (1, 1) tile-global max
    scale = jnp.exp(row_max - g)                                    # (TM, 1)
    col_part = jnp.sum(e * scale, axis=0, keepdims=True)            # (1, N) = sum_i exp(x_ij - g)

    prev_max = colmax_ref[...]                                      # (1, N)
    new_max = jnp.maximum(prev_max, g)                              # (1, N)
    colsum_ref[...] = (colsum_ref[...] * jnp.exp(prev_max - new_max)
                       + col_part * jnp.exp(g - new_max))
    colmax_ref[...] = new_max

    # ---- finalize on the last grid step ----
    @pl.when(t == n_tiles - 1)
    def _():
        lse_col = colmax_ref[...] + jnp.log(colsum_ref[...])        # (1, N)
        col_total = jnp.sum(lse_col, axis=-1, keepdims=True)        # (1, 1)
        out_ref[...] = (acc_ref[...] + col_total) * jnp.float32(1.0 / n_rows)


def _pick_tile_m(n, itemsize):
    """Largest power-of-two row tile (<= 512) whose working set stays well under scoped VMEM."""
    budget = 24 * 1024 * 1024  # conservative vs. v7x 32 MiB default scoped / 64 MiB physical
    tm = 512
    # ~ double-buffered input block + a handful of live f32 (TM, N) temps inside the body
    while tm > 8 and tm * n * (2 * itemsize + 5 * 4) > budget:
        tm //= 2
    return min(tm, n)


def cross_en(x, margin=0.0, tile_m=None):
    """Pallas implementation of CrossEn.forward. x: (N, N) float array -> scalar f32."""
    n = x.shape[0]
    assert x.ndim == 2 and x.shape[1] == n, "CrossEn expects a square similarity matrix"
    itemsize = x.dtype.itemsize

    if tile_m is None:
        tile_m = _pick_tile_m(n, itemsize)
    tile_m = min(int(tile_m), n)
    if tile_m != n and tile_m % 8 != 0:
        tile_m = max(8, (tile_m // 8) * 8)  # (8, 128) block constraint on the sublane dim

    grid = (pl.cdiv(n, tile_m),)
    kernel = functools.partial(_crossen_kernel, margin=float(margin), n_rows=n)

    # VMEM budget: double-buffered input tile + f32 temps + (1, N) accumulators + slack.
    vmem_need = 2 * tile_m * n * itemsize + 6 * tile_m * n * 4 + 4 * n * 4 + (1 << 20)
    vmem_limit = int(min(max(vmem_need, 16 * 1024 * 1024), 64 * 1024 * 1024))

    cost = pl.CostEstimate(
        flops=int(10 * n * n),
        transcendentals=int(n * n + 8 * n),   # one exp per element + O(N) exps/logs
        bytes_accessed=int(n * n * itemsize + 4),
    )

    out = pl.pallas_call(
        kernel,
        out_shape=jax.ShapeDtypeStruct((1, 1), jnp.float32),
        grid=grid,
        in_specs=[pl.BlockSpec((tile_m, n), lambda i: (i, 0))],
        out_specs=pl.BlockSpec((1, 1), lambda i: (0, 0)),
        scratch_shapes=[
            pltpu.VMEM((1, 1), jnp.float32),   # running sum(lse_row) - 2*sum(diag)
            pltpu.VMEM((1, n), jnp.float32),   # running column max
            pltpu.VMEM((1, n), jnp.float32),   # running column sum-exp (w.r.t. column max)
        ],
        compiler_params=pltpu.CompilerParams(
            dimension_semantics=("arbitrary",),
            vmem_limit_bytes=vmem_limit,
        ),
        cost_estimate=cost,
    )(x)
    return out[0, 0]


def _cross_en_ref(x, margin=0.0):
    """Pure-JAX reference mirroring the PyTorch module."""
    n = x.shape[0]
    eye = jnp.eye(n, dtype=bool)
    x = jnp.where(eye, x - margin, x)
    logpt_t = jax.nn.log_softmax(x, axis=-1)
    logpt_a = jax.nn.log_softmax(x.T, axis=-1)
    return (-jnp.diag(logpt_t)).mean() + (-jnp.diag(logpt_a)).mean()


if __name__ == "__main__":
    key = jax.random.PRNGKey(0)
    k1, k2, k3 = jax.random.split(key, 3)

    # Test 1: f32, default margin, auto tile (single-tile path).
    x1 = jax.random.normal(k1, (128, 128), dtype=jnp.float32)
    out1 = cross_en(x1)
    jax.block_until_ready(out1)
    ref1 = _cross_en_ref(x1)
    assert jnp.allclose(out1, ref1, atol=1e-4, rtol=1e-4), (out1, ref1)

    # Test 2: multi-tile grid with a ragged last tile + nonzero margin.
    x2 = jax.random.normal(k2, (120, 120), dtype=jnp.float32) * 4.0
    out2 = cross_en(x2, margin=0.25, tile_m=32)
    jax.block_until_ready(out2)
    ref2 = _cross_en_ref(x2, margin=0.25)
    assert jnp.allclose(out2, ref2, atol=1e-4, rtol=1e-4), (out2, ref2)

    # Test 3: bf16 input (halved HBM bytes on memory-bound v5e/v6e), cast per tile in-kernel.
    x3 = jax.random.normal(k3, (64, 64), dtype=jnp.float32).astype(jnp.bfloat16)
    out3 = cross_en(x3, tile_m=16)
    jax.block_until_ready(out3)
    ref3 = _cross_en_ref(x3.astype(jnp.float32))
    assert jnp.allclose(out3, ref3, atol=1e-3, rtol=1e-3), (out3, ref3)

    print("KERNEL_OK")
</pallas_src>

<mosaic_0001>
module attributes {stable_mosaic.version = 11 : i64} {
  func.func @_crossen_kernel(%arg0: i32, %arg1: memref<128x128xf32, #tpu.memory_space<vmem>>, %arg2: memref<1x1xf32, #tpu.memory_space<vmem>>, %arg3: memref<1x1xf32, #tpu.memory_space<vmem>>, %arg4: memref<1x128xf32, #tpu.memory_space<vmem>>, %arg5: memref<1x128xf32, #tpu.memory_space<vmem>>) attributes {dimension_semantics = [#tpu.dimension_semantics<arbitrary>], iteration_bounds = array<i64: 1>, scalar_prefetch = 0 : i64, scratch_operands = 3 : i64, tpu.core_type = #tpu.core_type<tc>, window_params = [{transform_indices = @transform_0, window_bounds = array<i64: 128, 128>}, {pipeline_mode = #tpu.pipeline_mode<synchronous>, transform_indices = @transform_1, window_bounds = array<i64: 1, 1>}]} {
    %c0 = arith.constant 0 : index
    %c0_0 = arith.constant 0 : index
    %0 = vector.load %arg1[%c0, %c0_0] : memref<128x128xf32, #tpu.memory_space<vmem>>, vector<128x128xf32>
    %c0_i32 = arith.constant 0 : i32
    %1 = arith.cmpi eq, %arg0, %c0_i32 : i32
    %2 = arith.extui %1 : i1 to i32
    %c0_i32_1 = arith.constant 0 : i32
    %3 = arith.cmpi ne, %2, %c0_i32_1 : i32
    scf.if %3 {
      %cst_23 = arith.constant 0.000000e+00 : f32
      %57 = vector.broadcast %cst_23 : f32 to vector<1x1xf32>
      %c0_24 = arith.constant 0 : index
      %c0_25 = arith.constant 0 : index
      %58 = vector.load %arg3[%c0_24, %c0_25] : memref<1x1xf32, #tpu.memory_space<vmem>>, vector<1x1xf32>
      tpu.vector_store %arg3[%c0_24, %c0_25], %57 {strides = array<i32>} : memref<1x1xf32, #tpu.memory_space<vmem>>, vector<1x1xf32>,
      %cst_26 = arith.constant 0xFF800000 : f32
      %59 = vector.broadcast %cst_26 : f32 to vector<1x128xf32>
      %c0_27 = arith.constant 0 : index
      %c0_28 = arith.constant 0 : index
      %60 = vector.load %arg4[%c0_27, %c0_28] : memref<1x128xf32, #tpu.memory_space<vmem>>, vector<1x128xf32>
      tpu.vector_store %arg4[%c0_27, %c0_28], %59 {strides = array<i32>} : memref<1x128xf32, #tpu.memory_space<vmem>>, vector<1x128xf32>,
      %cst_29 = arith.constant 0.000000e+00 : f32
      %61 = vector.broadcast %cst_29 : f32 to vector<1x128xf32>
      %c0_30 = arith.constant 0 : index
      %c0_31 = arith.constant 0 : index
      %62 = vector.load %arg5[%c0_30, %c0_31] : memref<1x128xf32, #tpu.memory_space<vmem>>, vector<1x128xf32>
      tpu.vector_store %arg5[%c0_30, %c0_31], %61 {strides = array<i32>} : memref<1x128xf32, #tpu.memory_space<vmem>>, vector<1x128xf32>,
    } else {
    }
    %4 = tpu.iota {dimensions = array<i32: 0>} : vector<128x128xi32>
    %c128_i32 = arith.constant 128 : i32
    %5 = arith.muli %arg0, %c128_i32 : i32
    %6 = vector.broadcast %5 : i32 to vector<128x128xi32>
    %7 = arith.addi %4, %6 : vector<128x128xi32>
    %8 = tpu.iota {dimensions = array<i32: 1>} : vector<128x128xi32>
    %9 = arith.cmpi eq, %7, %8 : vector<128x128xi32>
    %cst = arith.constant 0.000000e+00 : f32
    %10 = vector.broadcast %cst : f32 to vector<128x128xf32>
    %11 = arith.select %9, %0, %10 : vector<128x128xi1>, vector<128x128xf32>
    %cst_2 = arith.constant dense<0.000000e+00> : vector<128xf32>
    %12 = vector.multi_reduction <add>, %11, %cst_2 [1] : vector<128x128xf32> to vector<128xf32>
    %13 = vector.shape_cast %12 : vector<128xf32> to vector<128x1xf32>
    %cst_3 = arith.constant dense<0xFF800000> : vector<128xf32>
    %14 = vector.multi_reduction <maximumf>, %0, %cst_3 [1] : vector<128x128xf32> to vector<128xf32>
    %15 = vector.shape_cast %14 : vector<128xf32> to vector<128x1xf32>
    %16 = vector.broadcast %15 : vector<128x1xf32> to vector<128x128xf32>
    %17 = arith.subf %0, %16 : vector<128x128xf32>
    %18 = math.exp %17 : vector<128x128xf32>
    %cst_4 = arith.constant dense<0.000000e+00> : vector<128xf32>
    %19 = vector.multi_reduction <add>, %18, %cst_4 [1] : vector<128x128xf32> to vector<128xf32>
    %20 = vector.shape_cast %19 : vector<128xf32> to vector<128x1xf32>
    %21 = math.log %20 : vector<128x1xf32>
    %22 = arith.addf %15, %21 : vector<128x1xf32>
    %c0_5 = arith.constant 0 : index
    %c0_6 = arith.constant 0 : index
    %23 = vector.load %arg3[%c0_5, %c0_6] : memref<1x1xf32, #tpu.memory_space<vmem>>, vector<1x1xf32>
    %cst_7 = arith.constant 2.000000e+00 : f32
    %24 = vector.broadcast %cst_7 : f32 to vector<128x1xf32>
    %25 = arith.mulf %24, %13 : vector<128x1xf32>
    %26 = arith.subf %22, %25 : vector<128x1xf32>
    %cst_8 = arith.constant dense<0.000000e+00> : vector<1xf32>
    %27 = vector.multi_reduction <add>, %26, %cst_8 [0] : vector<128x1xf32> to vector<1xf32>
    %28 = vector.shape_cast %27 : vector<1xf32> to vector<1x1xf32>
    %29 = arith.addf %23, %28 : vector<1x1xf32>
    %c0_9 = arith.constant 0 : index
    %c0_10 = arith.constant 0 : index
    %30 = vector.load %arg3[%c0_9, %c0_10] : memref<1x1xf32, #tpu.memory_space<vmem>>, vector<1x1xf32>
    tpu.vector_store %arg3[%c0_9, %c0_10], %29 {strides = array<i32>} : memref<1x1xf32, #tpu.memory_space<vmem>>, vector<1x1xf32>,
    %cst_11 = arith.constant dense<0xFF800000> : vector<1xf32>
    %31 = vector.multi_reduction <maximumf>, %15, %cst_11 [0] : vector<128x1xf32> to vector<1xf32>
    %32 = vector.shape_cast %31 : vector<1xf32> to vector<1x1xf32>
    %33 = vector.broadcast %32 : vector<1x1xf32> to vector<128x1xf32>
    %34 = arith.subf %15, %33 : vector<128x1xf32>
    %35 = math.exp %34 : vector<128x1xf32>
    %36 = vector.broadcast %35 : vector<128x1xf32> to vector<128x128xf32>
    %37 = arith.mulf %18, %36 : vector<128x128xf32>
    %cst_12 = arith.constant dense<0.000000e+00> : vector<128xf32>
    %38 = vector.multi_reduction <add>, %37, %cst_12 [0] : vector<128x128xf32> to vector<128xf32>
    %39 = vector.shape_cast %38 : vector<128xf32> to vector<1x128xf32>
    %c0_13 = arith.constant 0 : index
    %c0_14 = arith.constant 0 : index
    %40 = vector.load %arg4[%c0_13, %c0_14] : memref<1x128xf32, #tpu.memory_space<vmem>>, vector<1x128xf32>
    %41 = vector.broadcast %32 : vector<1x1xf32> to vector<1x128xf32>
    %42 = arith.maximumf %40, %41 : vector<1x128xf32>
    %c0_15 = arith.constant 0 : index
    %c0_16 = arith.constant 0 : index
    %43 = vector.load %arg5[%c0_15, %c0_16] : memref<1x128xf32, #tpu.memory_space<vmem>>, vector<1x128xf32>
    %44 = arith.subf %40, %42 : vector<1x128xf32>
    %45 = math.exp %44 : vector<1x128xf32>
    %46 = arith.mulf %43, %45 : vector<1x128xf32>
    %47 = vector.broadcast %32 : vector<1x1xf32> to vector<1x128xf32>
    %48 = arith.subf %47, %42 : vector<1x128xf32>
    %49 = math.exp %48 : vector<1x128xf32>
    %50 = arith.mulf %39, %49 : vector<1x128xf32>
    %51 = arith.addf %46, %50 : vector<1x128xf32>
    %c0_17 = arith.constant 0 : index
    %c0_18 = arith.constant 0 : index
    %52 = vector.load %arg5[%c0_17, %c0_18] : memref<1x128xf32, #tpu.memory_space<vmem>>, vector<1x128xf32>
    tpu.vector_store %arg5[%c0_17, %c0_18], %51 {strides = array<i32>} : memref<1x128xf32, #tpu.memory_space<vmem>>, vector<1x128xf32>,
    %c0_19 = arith.constant 0 : index
    %c0_20 = arith.constant 0 : index
    %53 = vector.load %arg4[%c0_19, %c0_20] : memref<1x128xf32, #tpu.memory_space<vmem>>, vector<1x128xf32>
    tpu.vector_store %arg4[%c0_19, %c0_20], %42 {strides = array<i32>} : memref<1x128xf32, #tpu.memory_space<vmem>>, vector<1x128xf32>,
    %c0_i32_21 = arith.constant 0 : i32
    %54 = arith.cmpi eq, %arg0, %c0_i32_21 : i32
    %55 = arith.extui %54 : i1 to i32
    %c0_i32_22 = arith.constant 0 : i32
    %56 = arith.cmpi ne, %55, %c0_i32_22 : i32
    scf.if %56 {
      %c0_23 = arith.constant 0 : index
      %c0_24 = arith.constant 0 : index
      %57 = vector.load %arg4[%c0_23, %c0_24] : memref<1x128xf32, #tpu.memory_space<vmem>>, vector<1x128xf32>
      %c0_25 = arith.constant 0 : index
      %c0_26 = arith.constant 0 : index
      %58 = vector.load %arg5[%c0_25, %c0_26] : memref<1x128xf32, #tpu.memory_space<vmem>>, vector<1x128xf32>
      %59 = math.log %58 : vector<1x128xf32>
      %60 = arith.addf %57, %59 : vector<1x128xf32>
      %cst_27 = arith.constant dense<0.000000e+00> : vector<1xf32>
      %61 = vector.multi_reduction <add>, %60, %cst_27 [1] : vector<1x128xf32> to vector<1xf32>
      %62 = vector.shape_cast %61 : vector<1xf32> to vector<1x1xf32>
      %c0_28 = arith.constant 0 : index
      %c0_29 = arith.constant 0 : index
      %63 = vector.load %arg3[%c0_28, %c0_29] : memref<1x1xf32, #tpu.memory_space<vmem>>, vector<1x1xf32>
      %64 = arith.addf %63, %62 : vector<1x1xf32>
      %cst_30 = arith.constant 7.812500e-03 : f32
      %65 = vector.broadcast %cst_30 : f32 to vector<1x1xf32>
      %66 = arith.mulf %64, %65 : vector<1x1xf32>
      %c0_31 = arith.constant 0 : index
      %c0_32 = arith.constant 0 : index
      %67 = vector.load %arg2[%c0_31, %c0_32] : memref<1x1xf32, #tpu.memory_space<vmem>>, vector<1x1xf32>
      tpu.vector_store %arg2[%c0_31, %c0_32], %66 {strides = array<i32>} : memref<1x1xf32, #tpu.memory_space<vmem>>, vector<1x1xf32>,
    } else {
    }
    return
  }
  func.func @transform_0(%arg0: i32) -> (i32, i32) {
    %c0_i32 = arith.constant 0 : i32
    %c0_i32_0 = arith.constant 0 : i32
    return %arg0, %c0_i32 : i32, i32
  }
  func.func @transform_1(%arg0: i32) -> (i32, i32) {
    %c0_i32 = arith.constant 0 : i32
    %c0_i32_0 = arith.constant 0 : i32
    %c0_i32_1 = arith.constant 0 : i32
    return %c0_i32, %c0_i32_0 : i32, i32
  }
}

</mosaic_0001>

<bundles_post_ra>
// kernel: tpu_custom_call.1
= control target key start
LH: loop header
LB: loop body
LE: loop exit
PB: predicated region body
PF: predicated region fallthrough
CT: control target
= control target key end

     0   :  { %6 = vsyncpa [#allocation6], 0  ;;  %s1017_s0 = inlined_call_operand.hbm [shape: f32[128,128], index: 0, kind: input, shape index: {}]   ;;  %s1018_s1 = inlined_call_operand.hbm [shape: f32[1,1], index: 1, kind: output, shape index: {}]  }
   0x1   :  { %7 = vsyncpa [#allocation7], 0  ;;  %s672_s6 = smov [#allocation5]   ;;  %s624_s10 = scalar_lea.hbm %s1017_s0, 2048 }
   0x2   :  { %s13_s7 = sshll.u32 %s672_s6, 4  ;;  %p625_p0 = scmp.ne.s32.totalorder %s1017_s0, %s624_s10  ;;  %s14_s7 = int_to_ptr.vmem [resolvable:$true] %s13_s7 }
   0x3   :  { %p628_p1 = scmp.lt.u32.totalorder %s624_s10, %s1017_s0 }
   0x5   :  { %p630_p2 = pnand %p628_p1, %p625_p0 }
   0x7   :  { %633 = shalt.err (!%p630_p2)
}
   0x8   :  { %s634_s15 = scalar_lea.vmem %s14_s7, 2048  ;;  %p639_p4 = scmp.lt.s32.totalorder %s14_s7, %s14_s7 }
   0x9   :  { %p635_p3 = scmp.ne.s32.totalorder %s14_s7, %s634_s15  ;;  %p640_p5 = scmp.lt.s32.totalorder %s634_s15, %s634_s15 }
   0xb   :  { %p641_p6 = por %p640_p5, %p639_p4 }
   0xd   :  { %p642_p7 = pnand %p641_p6, %p635_p3 }
   0xf   :  { %645 = shalt.err (!%p642_p7)
}
  0x10   :  { %s673_s16 = smov 128   ;;  %s674_s17 = smov 8  }
  0x11   :  { %19 = dma.hbm_to_vmem [thread:$0]  %s1017_s0, 2048, %s14_s7, [#allocation6], %s673_s16, %s673_s16, %s674_s17  }
  0x12   :  { %668 = dma.done.wait [#allocation6], 2048  }
  0x13   :  { %669 = vsyncadd [#allocation6], 4294965248  ;;  %v700_v0 = vld [vmem:[#allocation5 + $0x10] sm:$0xff]  ;;  %v23_v1 = vld [vmem:[#allocation5] sm:$0xff]  ;;  %v47_v10 = vlaneseq  ;;  %v675_v28 = vmov -inf   ;;  %v676_v29 = vmov 0.0  }
  0x14   :  { %152 = vmax.xlane.f32.xlu1 %v700_v0  ;;  %148 = vmax.xlane.f32.xlu0 %v23_v1  ;;  %v703_v2 = vld [vmem:[#allocation5 + $0x18] sm:$0xff]  ;;  %v705_v3 = vld [vmem:[#allocation5 + $0x8] sm:$0xff]  ;;  %v711_v5 = vld [vmem:[#allocation5 + $0x20] sm:$0xff]  ;;  %45 = vst [vmem:[#allocation3] sm:$0x1] %v675_v28  ;;  %s677_s0 = smov [#allocation8]  }
  0x15   :  { %v709_v4 = vld [vmem:[#allocation5 + $0x28] sm:$0xff]  ;;  %v715_v6 = vld [vmem:[#allocation5 + $0x38] sm:$0xff]  ;;  %v717_v7 = vld [vmem:[#allocation5 + $0x30] sm:$0xff]  ;;  %v731_v13 = vshrl.u32 %v47_v10, 7  ;;  %v740_v17 = vand.u32 127, %v47_v10  ;;  %s507_s20 = sshll.u32 %s677_s0, 4  ;;  %s508_s20 = int_to_ptr.vmem [resolvable:$true] %s507_s20 }
  0x16   :  { %v721_v8 = vld [vmem:[#allocation5 + $0x48] sm:$0xff]  ;;  %v723_v9 = vld [vmem:[#allocation5 + $0x40] sm:$0xff]  ;;  %v727_v11 = vld [vmem:[#allocation5 + $0x58] sm:$0xff]  ;;  %46 = vst [vmem:[#allocation4] sm:$0x1] %v676_v29  ;;  %s646_s21 = scalar_lea.vmem %s508_s20, 16  ;;  %p651_p9 = scmp.lt.s32.totalorder %s508_s20, %s508_s20 }
  0x17   :  { %v729_v12 = vld [vmem:[#allocation5 + $0x50] sm:$0xff]  ;;  %v735_v14 = vld [vmem:[#allocation5 + $0x68] sm:$0xff]  ;;  %v737_v15 = vld [vmem:[#allocation5 + $0x60] sm:$0xff]  ;;  %v49_v16 = vadd.s32 8, %v731_v13  ;;  %v50_v20 = vadd.s32 16, %v731_v13  ;;  %vm84_vm1 = vcmp.eq.s32.totalorder %v731_v13, %v740_v17  ;;  %v51_v23 = vadd.s32 24, %v731_v13  ;;  %p647_p8 = scmp.ne.s32.totalorder %s508_s20, %s646_s21 }
  0x18   :  { %154 = vmax.xlane.f32.xlu1 %v703_v2  ;;  %150 = vmax.xlane.f32.xlu0 %v705_v3  ;;  %v744_v18 = vld [vmem:[#allocation5 + $0x78] sm:$0xff]  ;;  %v746_v19 = vld [vmem:[#allocation5 + $0x70] sm:$0xff]  ;;  %v100_v22 = vsel %vm84_vm1, %v23_v1, 0.0  ;;  %v52_v25 = vadd.s32 32, %v731_v13  ;;  %vm493_vm1 = vcmask 1040384   ;;  %s650_s22 = scalar_lea.vmem %s508_s20, 32 }
  0x19   :  { %vm85_vm0 = vcmp.eq.s32.totalorder %v49_v16, %v740_v17  ;;  %vm86_vm2 = vcmp.eq.s32.totalorder %v50_v20, %v740_v17  ;;  %vm87_vm3 = vcmp.eq.s32.totalorder %v51_v23, %v740_v17  ;;  %p652_p10 = scmp.lt.s32.totalorder %s650_s22, %s646_s21 }
  0x1a   :  { %v101_v21 = vsel %vm85_vm0, %v705_v3, 0.0  ;;  %v102_v24 = vsel %vm86_vm2, %v700_v0, 0.0  ;;  %v103_v26 = vsel %vm87_vm3, %v703_v2, 0.0  ;;  %vm88_vm4 = vcmp.eq.s32.totalorder %v52_v25, %v740_v17 }
  0x1b   :  { %v104_v27 = vsel %vm88_vm4, %v711_v5, 0.0  ;;  %vm43_vm0 = vcmask 0   ;;  %p653_p11 = por %p652_p10, %p651_p9 }
  0x1c   :  { %158 = vmax.xlane.f32.xlu1 %v709_v4  ;;  %156 = vmax.xlane.f32.xlu0 %v711_v5  ;;  %44 = vst.msk [vmem:[#allocation2] sm:$0x1] %vm43_vm0, %v676_v29 }
  0x1d   :  { %p654_p12 = pnand %p653_p11, %p647_p8 }
  0x20   :  { %162 = vmax.xlane.f32.xlu1 %v715_v6  ;;  %160 = vmax.xlane.f32.xlu0 %v717_v7 }
  0x24   :  { %166 = vmax.xlane.f32.xlu1 %v721_v8  ;;  %164 = vmax.xlane.f32.xlu0 %v723_v9 }
  0x28   :  { %170 = vmax.xlane.f32.xlu1 %v727_v11  ;;  %168 = vmax.xlane.f32.xlu0 %v729_v12 }
  0x2c   :  { %174 = vmax.xlane.f32.xlu1 %v735_v14  ;;  %172 = vmax.xlane.f32.xlu0 %v737_v15 }
  0x30   :  { %178 = vmax.xlane.f32.xlu1 %v744_v18  ;;  %176 = vmax.xlane.f32.xlu0 %v746_v19 }
  0x34   :  { %118 = vadd.xlane.f32.xlu1 %v101_v21  ;;  %116 = vadd.xlane.f32.xlu0 %v100_v22 }
  0x38   :  { %120 = vadd.xlane.f32.xlu1 %v102_v24 }
  0x3c   :  { %122 = vadd.xlane.f32.xlu1 %v103_v26 }
  0x40   :  { %124 = vadd.xlane.f32.xlu1 %v104_v27 }
  0xa1   :  { %v764_v30 = vpop.xlane.xlu1 %152  ;;  %v766_v31 = vpop.xlane.xlu0 %148 }
  0xa2   :  { %v182_v32 = vsub.f32 %v700_v0, %v764_v30  ;;  %v180_v33 = vsub.f32 %v23_v1, %v766_v31 }
  0xa4   :  { %v196_v34 = vmul.f32 1.442695, %v180_v33  ;;  %v200_v37 = vmul.f32 1.442695, %v182_v32  ;;  %v53_v32 = vadd.s32 40, %v731_v13 }
  0xa5   :  { %v771_v35 = vpop.xlane.xlu1 %154  ;;  %v773_v36 = vpop.xlane.xlu0 %150 }
  0xa6   :  { %v183_v38 = vsub.f32 %v703_v2, %v771_v35  ;;  %v181_v39 = vsub.f32 %v705_v3, %v773_v36  ;;  %522 = vpow2.f32 %v196_v34  ;;  %vm89_vm5 = vcmp.eq.s32.totalorder %v53_v32, %v740_v17 }
  0xa7   :  { %524 = vpow2.f32 %v200_v37 }
  0xa8   :  { %v198_v40 = vmul.f32 1.442695, %v181_v39  ;;  %v202_v43 = vmul.f32 1.442695, %v183_v38 }
  0xa9   :  { %v779_v41 = vpop.xlane.xlu1 %158  ;;  %v781_v42 = vpop.xlane.xlu0 %156 }
  0xaa   :  { %v185_v44 = vsub.f32 %v709_v4, %v779_v41  ;;  %v184_v45 = vsub.f32 %v711_v5, %v781_v42  ;;  %526 = vpow2.f32 %v198_v40  ;;  %v366_v3 = vmax.f32 %v773_v36, %v779_v41 }
  0xab   :  { %528 = vpow2.f32 %v202_v43  ;;  %v365_v10 = vmax.f32 %v766_v31, %v781_v42 }
  0xac   :  { %v204_v46 = vmul.f32 1.442695, %v184_v45  ;;  %v206_v49 = vmul.f32 1.442695, %v185_v44 }
  0xad   :  { %v787_v47 = vpop.xlane.xlu1 %162  ;;  %v789_v48 = vpop.xlane.xlu0 %160 }
  0xae   :  { %v187_v50 = vsub.f32 %v715_v6, %v787_v47  ;;  %v186_v51 = vsub.f32 %v717_v7, %v789_v48  ;;  %530 = vpow2.f32 %v204_v46  ;;  %v368_v21 = vmax.f32 %v771_v35, %v787_v47 }
  0xaf   :  { %532 = vpow2.f32 %v206_v49  ;;  %v367_v22 = vmax.f32 %v764_v30, %v789_v48 }
  0xb0   :  { %v208_v52 = vmul.f32 1.442695, %v186_v51  ;;  %v795_v53 = vpop.eup %522  ;;  %v210_v56 = vmul.f32 1.442695, %v187_v50  ;;  %v54_v50 = vadd.s32 48, %v731_v13 }
  0xb1   :  { %v797_v54 = vpop.xlane.xlu1 %166  ;;  %v799_v55 = vpop.xlane.xlu0 %164  ;;  %228 = vadd.xlane.f32.xlu0 %v795_v53 }
  0xb2   :  { %v188_v57 = vsub.f32 %v723_v9, %v799_v55  ;;  %534 = vpow2.f32 %v208_v52  ;;  %v189_v58 = vsub.f32 %v721_v8, %v797_v54  ;;  %v806_v59 = vpop.eup %524  ;;  %v370_v23 = vmax.f32 %v366_v3, %v797_v54 }
  0xb3   :  { %536 = vpow2.f32 %v210_v56  ;;  %v369_v24 = vmax.f32 %v365_v10, %v799_v55  ;;  %vm90_vm6 = vcmp.eq.s32.totalorder %v54_v50, %v740_v17 }
  0xb4   :  { %v212_v60 = vmul.f32 1.442695, %v188_v57  ;;  %v808_v61 = vpop.eup %526  ;;  %v214_v0 = vmul.f32 1.442695, %v189_v58  ;;  %v105_v58 = vsel %vm89_vm5, %v709_v4, 0.0 }
  0xb5   :  { %v810_v62 = vpop.xlane.xlu1 %170  ;;  %v812_v63 = vpop.xlane.xlu0 %168  ;;  %230 = vadd.xlane.f32.xlu1 %v808_v61  ;;  %232 = vadd.xlane.f32.xlu0 %v806_v59 }
  0xb6   :  { %538 = vpow2.f32 %v212_v60  ;;  %v190_v1 = vsub.f32 %v729_v12, %v812_v63  ;;  %v818_v2 = vpop.eup %528  ;;  %v191_v25 = vsub.f32 %v727_v11, %v810_v62  ;;  %v372_v28 = vmax.f32 %v368_v21, %v810_v62 }
  0xb7   :  { %540 = vpow2.f32 %v214_v0  ;;  %v371_v34 = vmax.f32 %v367_v22, %v812_v63  ;;  %v106_v22 = vsel %vm90_vm6, %v717_v7, 0.0 }
  0xb8   :  { %v822_v5 = vpop.eup %530  ;;  %v216_v26 = vmul.f32 1.442695, %v190_v1  ;;  %v218_v44 = vmul.f32 1.442695, %v191_v25  ;;  %v55_v1 = vadd.s32 56, %v731_v13 }
  0xb9   :  { %v826_v16 = vpop.xlane.xlu1 %174  ;;  %v828_v20 = vpop.xlane.xlu0 %172  ;;  %234 = vadd.xlane.f32.xlu1 %v818_v2  ;;  %236 = vadd.xlane.f32.xlu0 %v822_v5 }
  0xba   :  { %v840_v27 = vpop.eup %532  ;;  %v374_v37 = vmax.f32 %v370_v23, %v826_v16  ;;  %v373_v38 = vmax.f32 %v369_v24, %v828_v20  ;;  %542 = vpow2.f32 %v216_v26  ;;  %v192_v49 = vsub.f32 %v737_v15, %v828_v20 }
  0xbb   :  { %544 = vpow2.f32 %v218_v44  ;;  %v193_v60 = vsub.f32 %v735_v14, %v826_v16  ;;  %v56_v23 = vadd.s32 64, %v731_v13  ;;  %vm91_vm7 = vcmp.eq.s32.totalorder %v55_v1, %v740_v17 }
  0xbc   :  { %v844_v33 = vpop.eup %534  ;;  %v377_v52 = vmax.f32 %v373_v38, %v374_v37  ;;  %v220_v0 = vmul.f32 1.442695, %v192_v49  ;;  %v107_v32 = vsel %vm91_vm7, %v715_v6, 0.0  ;;  %v57_v37 = vadd.s32 72, %v731_v13 }
  0xbd   :  { %v849_v39 = vpop.xlane.xlu1 %178  ;;  %v851_v40 = vpop.xlane.xlu0 %176  ;;  %238 = vadd.xlane.f32.xlu1 %v840_v27  ;;  %240 = vadd.xlane.f32.xlu0 %v844_v33  ;;  %v222_v4 = vmul.f32 1.442695, %v193_v60  ;;  %vm92_vm8 = vcmp.eq.s32.totalorder %v56_v23, %v740_v17  ;;  %v59_v49 = vadd.s32 88, %v731_v13 }
  0xbe   :  { %v376_v43 = vmax.f32 %v372_v28, %v849_v39  ;;  %v375_v45 = vmax.f32 %v371_v34, %v851_v40  ;;  %v857_v46 = vpop.eup %536  ;;  %546 = vpow2.f32 %v220_v0  ;;  %v194_v24 = vsub.f32 %v746_v19, %v851_v40 }
  0xbf   :  { %548 = vpow2.f32 %v222_v4  ;;  %v195_v7 = vsub.f32 %v744_v18, %v849_v39  ;;  %vm93_vm9 = vcmp.eq.s32.totalorder %v57_v37, %v740_v17  ;;  %v61_v0 = vadd.s32 104, %v731_v13 }
  0xc0   :  { %v863_v51 = vpop.eup %538  ;;  %v378_v56 = vmax.f32 %v375_v45, %v376_v43  ;;  %v224_v34 = vmul.f32 1.442695, %v194_v24  ;;  %v108_v45 = vsel %vm92_vm8, %v723_v9, 0.0  ;;  %v109_v60 = vsel %vm93_vm9, %v721_v8, 0.0 }
  0xc1   :  { %242 = vadd.xlane.f32.xlu1 %v857_v46  ;;  %244 = vadd.xlane.f32.xlu0 %v863_v51  ;;  %v872_v3 = vpop.eup %540  ;;  %v226_v6 = vmul.f32 1.442695, %v195_v7  ;;  %vm95_vm10 = vcmp.eq.s32.totalorder %v59_v49, %v740_v17  ;;  %vm97_vm11 = vcmp.eq.s32.totalorder %v61_v0, %v740_v17  ;;  %v63_v7 = vadd.s32 120, %v731_v13 }
  0xc2   :  { %v379_v57 = vmax.f32 %v377_v52, %v378_v56  ;;  %550 = vpow2.f32 %v224_v34  ;;  %v58_v34 = vadd.s32 80, %v731_v13 }
  0xc3   :  { %552 = vpow2.f32 %v226_v6  ;;  %vm99_vm12 = vcmp.eq.s32.totalorder %v63_v7, %v740_v17 }
  0xc4   :  { %v380_v10 = vrot.slane %v379_v57, 4  ;;  %v880_v25 = vpop.eup %542  ;;  %vm94_vm13 = vcmp.eq.s32.totalorder %v58_v34, %v740_v17 }
  0xc5   :  { %126 = vadd.xlane.f32.xlu1 %v105_v58  ;;  %246 = vadd.xlane.f32.xlu0 %v872_v3  ;;  %v888_v38 = vpop.eup %544  ;;  %v904_v58 = vld [vmem:[#allocation3] sm:$0x1] }
  0xc6   :  { %v381_v21 = vmax.f32 %v379_v57, %v380_v10 }
  0xc8   :  { %v382_v26 = vrot.slane %v381_v21, 2  ;;  %v902_v57 = vpop.eup %546 }
  0xc9   :  { %128 = vadd.xlane.f32.xlu1 %v106_v22  ;;  %248 = vadd.xlane.f32.xlu0 %v880_v25  ;;  %v918_v4 = vpop.eup %548 }
  0xca   :  { %v383_v28 = vmax.f32 %v381_v21, %v382_v26  ;;  %v111_v26 = vsel %vm95_vm10, %v727_v11, 0.0  ;;  %v113_v11 = vsel %vm97_vm11, %v735_v14, 0.0  ;;  %v115_v14 = vsel %vm99_vm12, %v744_v18, 0.0 }
  0xcc   :  { %v384_v43 = vrot.slane %v383_v28, 1  ;;  %v930_v37 = vpop.eup %550 }
  0xcd   :  { %130 = vadd.xlane.f32.xlu1 %v107_v32  ;;  %250 = vadd.xlane.f32.xlu0 %v888_v38 }
  0xce   :  { %v891_v44 = vmax.f32 %v383_v28, %v384_v43 }
  0xd0   :  { %v386_v50 = vsub.f32 %v766_v31, %v891_v44  ;;  %v387_v52 = vsub.f32 %v773_v36, %v891_v44  ;;  %v388_v56 = vsub.f32 %v764_v30, %v891_v44  ;;  %v389_v9 = vsub.f32 %v771_v35, %v891_v44 }
  0xd1   :  { %132 = vadd.xlane.f32.xlu1 %v108_v45  ;;  %252 = vadd.xlane.f32.xlu0 %v902_v57  ;;  %v390_v1 = vsub.f32 %v781_v42, %v891_v44  ;;  %v916_v23 = vmax.f32 %v904_v58, %v891_v44  ;;  %v391_v8 = vsub.f32 %v779_v41, %v891_v44 }
  0xd2   :  { %v402_v10 = vmul.f32 1.442695, %v386_v50  ;;  %v404_v21 = vmul.f32 1.442695, %v387_v52  ;;  %v406_v22 = vmul.f32 1.442695, %v388_v56  ;;  %v392_v28 = vsub.f32 %v789_v48, %v891_v44  ;;  %v941_v52 = vpop.eup %552 }
  0xd3   :  { %v408_v24 = vmul.f32 1.442695, %v389_v9  ;;  %484 = vst [vmem:[#allocation3] sm:$0x1] %v916_v23  ;;  %v410_v32 = vmul.f32 1.442695, %v390_v1  ;;  %v393_v43 = vsub.f32 %v787_v47, %v891_v44  ;;  %v394_v6 = vsub.f32 %v799_v55, %v891_v44 }
  0xd4   :  { %554 = vpow2.f32 %v402_v10  ;;  %v412_v45 = vmul.f32 1.442695, %v391_v8  ;;  %v414_v49 = vmul.f32 1.442695, %v392_v28  ;;  %v60_v50 = vadd.s32 96, %v731_v13 }
  0xd5   :  { %134 = vadd.xlane.f32.xlu1 %v109_v60  ;;  %254 = vadd.xlane.f32.xlu0 %v918_v4  ;;  %556 = vpow2.f32 %v404_v21  ;;  %v395_v56 = vsub.f32 %v797_v54, %v891_v44  ;;  %v416_v9 = vmul.f32 1.442695, %v393_v43  ;;  %v396_v60 = vsub.f32 %v812_v63, %v891_v44 }
  0xd6   :  { %558 = vpow2.f32 %v406_v22  ;;  %v418_v0 = vmul.f32 1.442695, %v394_v6  ;;  %v110_v1 = vsel %vm94_vm13, %v729_v12, 0.0  ;;  %vm96_vm14 = vcmp.eq.s32.totalorder %v60_v50, %v740_v17 }
  0xd7   :  { %560 = vpow2.f32 %v408_v24  ;;  %v62_v21 = vadd.s32 112, %v731_v13  ;;  %v397_v8 = vsub.f32 %v810_v62, %v891_v44  ;;  %v420_v24 = vmul.f32 1.442695, %v395_v56 }
  0xd8   :  { %562 = vpow2.f32 %v410_v32  ;;  %v398_v12 = vsub.f32 %v828_v20, %v891_v44  ;;  %v422_v7 = vmul.f32 1.442695, %v396_v60  ;;  %v112_v13 = vsel %vm96_vm14, %v737_v15, 0.0 }
  0xd9   :  { %138 = vadd.xlane.f32.xlu1 %v111_v26  ;;  %256 = vadd.xlane.f32.xlu0 %v930_v37  ;;  %564 = vpow2.f32 %v412_v45  ;;  %vm98_vm15 = vcmp.eq.s32.totalorder %v62_v21, %v740_v17  ;;  %v400_v50 = vsub.f32 %v851_v40, %v891_v44 }
  0xda   :  { %566 = vpow2.f32 %v414_v49  ;;  %v426_v15 = vmul.f32 1.442695, %v398_v12 }
  0xdb   :  { %568 = vpow2.f32 %v416_v9 }
  0xdc   :  { %570 = vpow2.f32 %v418_v0 }
  0xdd   :  { %142 = vadd.xlane.f32.xlu1 %v113_v11  ;;  %258 = vadd.xlane.f32.xlu0 %v941_v52  ;;  %572 = vpow2.f32 %v420_v24 }
  0xde   :  { %v555_v10 = vpop.eup %554  ;;  %574 = vpow2.f32 %v422_v7 }
  0xdf   :  { %v557_v22 = vpop.eup %556  ;;  %v434_v18 = vmul.f32 %v555_v10, %v795_v53  ;;  %v399_v53 = vsub.f32 %v826_v16, %v891_v44  ;;  %v430_v10 = vmul.f32 1.442695, %v400_v50 }
  0xe0   :  { %v559_v26 = vpop.eup %558  ;;  %v435_v28 = vmul.f32 %v557_v22, %v808_v61  ;;  %v424_v61 = vmul.f32 1.442695, %v397_v8 }
  0xe1   :  { %146 = vadd.xlane.f32.xlu1 %v115_v14  ;;  %136 = vadd.xlane.f32.xlu0 %v110_v1  ;;  %v561_v32 = vpop.eup %560  ;;  %v436_v34 = vmul.f32 %v559_v26, %v806_v59  ;;  %v114_v59 = vsel %vm98_vm15, %v746_v19, 0.0  ;;  %v401_v14 = vsub.f32 %v849_v39, %v891_v44  ;;  %v428_v60 = vmul.f32 1.442695, %v399_v53 }
  0xe2   :  { %v450_v43 = vadd.f32 %v435_v28, %v434_v18  ;;  %v563_v45 = vpop.eup %562  ;;  %v437_v11 = vmul.f32 %v561_v32, %v818_v2  ;;  %576 = vpow2.f32 %v424_v61 }
  0xe3   :  { %v565_v49 = vpop.eup %564  ;;  %v438_v17 = vmul.f32 %v563_v45, %v822_v5  ;;  %578 = vpow2.f32 %v426_v15  ;;  %v432_v5 = vmul.f32 1.442695, %v401_v14 }
  0xe4   :  { %v451_v6 = vadd.f32 %v450_v43, %v436_v34  ;;  %v567_v9 = vpop.eup %566  ;;  %v439_v2 = vmul.f32 %v565_v49, %v840_v27  ;;  %580 = vpow2.f32 %v428_v60 }
  0xe5   :  { %140 = vadd.xlane.f32.xlu0 %v112_v13  ;;  %v569_v1 = vpop.eup %568  ;;  %v440_v21 = vmul.f32 %v567_v9, %v844_v33  ;;  %582 = vpow2.f32 %v430_v10 }
  0xe6   :  { %v452_v56 = vadd.f32 %v451_v6, %v437_v11  ;;  %v571_v19 = vpop.eup %570  ;;  %v441_v8 = vmul.f32 %v569_v1, %v857_v46  ;;  %584 = vpow2.f32 %v432_v5 }
  0xe7   :  { %v573_v18 = vpop.eup %572  ;;  %v442_v26 = vmul.f32 %v571_v19, %v863_v51  ;;  %v474_v51 = vsub.f32 %v904_v58, %v916_v23  ;;  %v488_v19 = vld [vmem:[#allocation3] sm:$0x1] }
  0xe8   :  { %v453_v0 = vadd.f32 %v452_v56, %v438_v17  ;;  %v575_v27 = vpop.eup %574  ;;  %v443_v32 = vmul.f32 %v573_v18, %v872_v3 }
  0xe9   :  { %144 = vadd.xlane.f32.xlu0 %v114_v59  ;;  %v444_v33 = vmul.f32 %v575_v27, %v880_v25  ;;  %v478_v25 = vsub.f32 %v891_v44, %v916_v23 }
  0xea   :  { %v454_v22 = vadd.f32 %v453_v0, %v439_v2  ;;  %v473_v0 = vld [vmem:[#allocation4] sm:$0x1] }
  0xec   :  { %v455_v24 = vadd.f32 %v454_v22, %v440_v21  ;;  %v577_v7 = vpop.eup %576 }
  0xed   :  { %v579_v34 = vpop.eup %578  ;;  %v445_v43 = vmul.f32 %v577_v7, %v888_v38  ;;  %v475_v38 = vmul.f32 1.442695, %v474_v51 }
  0xee   :  { %v456_v28 = vadd.f32 %v455_v24, %v441_v8  ;;  %v581_v46 = vpop.eup %580  ;;  %v446_v53 = vmul.f32 %v579_v34, %v902_v57  ;;  %v479_v57 = vmul.f32 1.442695, %v478_v25  ;;  %v119_v24 = vpop.xlane.xlu1 %118 }
  0xef   :  { %v583_v11 = vpop.eup %582  ;;  %v447_v6 = vmul.f32 %v581_v46, %v918_v4  ;;  %586 = vpow2.f32 %v475_v38 }
  0xf0   :  { %v457_v12 = vadd.f32 %v456_v28, %v442_v26  ;;  %v585_v49 = vpop.eup %584  ;;  %v448_v50 = vmul.f32 %v583_v11, %v930_v37  ;;  %588 = vpow2.f32 %v479_v57  ;;  %v117_v28 = vpop.xlane.xlu0 %116 }
  0xf1   :  { %v449_v59 = vmul.f32 %v585_v49, %v941_v52  ;;  %v309_v11 = vmul.f32 2.0, %v117_v28 }
  0xf2   :  { %v458_v13 = vadd.f32 %v457_v12, %v443_v32  ;;  %v121_v18 = vpop.xlane.xlu1 %120 }
  0xf3   :  { %v311_v38 = vmul.f32 2.0, %v121_v18 }
  0xf4   :  { %v459_v45 = vadd.f32 %v458_v13, %v444_v33 }
  0xf6   :  { %v460_v61 = vadd.f32 %v459_v45, %v445_v43  ;;  %v123_v26 = vpop.xlane.xlu1 %122 }
  0xf8   :  { %v461_v3 = vadd.f32 %v460_v61, %v446_v53  ;;  %v310_v61 = vmul.f32 2.0, %v119_v24 }
  0xf9   :  { %v587_v2 = vpop.eup %586 }
  0xfa   :  { %v462_v15 = vadd.f32 %v461_v3, %v447_v6  ;;  %v589_v23 = vpop.eup %588  ;;  %v477_v37 = vmul.f32 %v587_v2, %v473_v0  ;;  %v125_v29 = vpop.xlane.xlu1 %124 }
  0xfc   :  { %v463_v17 = vadd.f32 %v462_v15, %v448_v50 }
  0xfe   :  { %v464_v56 = vadd.f32 %v463_v17, %v449_v59 }
 0x100   :  { %v465_v9 = vrot.slane %v464_v56, 4 }
 0x102   :  { %v466_v58 = vadd.f32 %v465_v9, %v464_v56 }
 0x104   :  { %v467_v14 = vrot.slane %v466_v58, 2 }
 0x106   :  { %v468_v4 = vadd.f32 %v467_v14, %v466_v58 }
 0x108   :  { %v469_v60 = vrot.slane %v468_v4, 1 }
 0x10a   :  { %v470_v44 = vadd.f32 %v469_v60, %v468_v4  ;;  %v312_v4 = vmul.f32 2.0, %v123_v26 }
 0x10c   :  { %v481_v52 = vmul.f32 %v589_v23, %v470_v44 }
 0x10e   :  { %v482_v1 = vadd.f32 %v481_v52, %v477_v37 }
 0x110   :  { %483 = vst [vmem:[#allocation4] sm:$0x1] %v482_v1 }
 0x117   :  { %v489_v10 = vld [vmem:[#allocation4] sm:$0x1] }
 0x118   :  { %590 = vlog2.f32 %v489_v10 }
 0x122   :  { %v591_v21 = vpop.eup %590 }
 0x123   :  { %v491_v22 = vmul.f32 0.6931472, %v591_v21 }
 0x125   :  { %v492_v5 = vadd.f32 %v491_v22, %v488_v19 }
 0x127   :  { %v494_v8 = vsel %vm493_vm1, %v492_v5, 0.0 }
 0x128   :  { %495 = vadd.xlane.f32.xlu0 %v494_v8 }
 0x13e   :  { %v229_v27 = vpop.xlane.xlu0 %228 }
 0x13f   :  { %592 = vlog2.f32 %v229_v27 }
 0x142   :  { %v231_v32 = vpop.xlane.xlu1 %230  ;;  %v233_v12 = vpop.xlane.xlu0 %232 }
 0x143   :  { %594 = vlog2.f32 %v231_v32 }
 0x144   :  { %596 = vlog2.f32 %v233_v12 }
 0x146   :  { %v235_v7 = vpop.xlane.xlu1 %234  ;;  %v237_v33 = vpop.xlane.xlu0 %236 }
 0x147   :  { %598 = vlog2.f32 %v235_v7 }
 0x148   :  { %600 = vlog2.f32 %v237_v33 }
 0x149   :  { %v593_v13 = vpop.eup %592 }
 0x14a   :  { %v261_v34 = vmul.f32 0.6931472, %v593_v13  ;;  %v239_v43 = vpop.xlane.xlu1 %238  ;;  %v241_v45 = vpop.xlane.xlu0 %240 }
 0x14b   :  { %602 = vlog2.f32 %v239_v43 }
 0x14c   :  { %v292_v51 = vadd.f32 %v261_v34, %v766_v31  ;;  %604 = vlog2.f32 %v241_v45 }
 0x14d   :  { %v595_v46 = vpop.eup %594 }
 0x14e   :  { %v597_v53 = vpop.eup %596  ;;  %v263_v6 = vmul.f32 0.6931472, %v595_v46  ;;  %v243_v3 = vpop.xlane.xlu1 %242  ;;  %v325_v57 = vsub.f32 %v292_v51, %v309_v11 }
 0x14f   :  { %v245_v49 = vpop.xlane.xlu0 %244  ;;  %v265_v25 = vmul.f32 0.6931472, %v597_v53  ;;  %606 = vlog2.f32 %v243_v3 }
 0x150   :  { %v293_v50 = vadd.f32 %v263_v6, %v773_v36  ;;  %608 = vlog2.f32 %v245_v49 }
 0x151   :  { %v599_v15 = vpop.eup %598  ;;  %v294_v59 = vadd.f32 %v265_v25, %v764_v30  ;;  %v313_v30 = vmul.f32 2.0, %v125_v29 }
 0x152   :  { %v601_v17 = vpop.eup %600  ;;  %v326_v56 = vsub.f32 %v293_v50, %v310_v61  ;;  %v267_v9 = vmul.f32 0.6931472, %v599_v15  ;;  %v127_v58 = vpop.xlane.xlu1 %126 }
 0x153   :  { %v247_v14 = vpop.xlane.xlu0 %246  ;;  %v327_v0 = vsub.f32 %v294_v59, %v311_v38  ;;  %v269_v44 = vmul.f32 0.6931472, %v601_v17  ;;  %v314_v8 = vmul.f32 2.0, %v127_v58 }
 0x154   :  { %v341_v31 = vadd.f32 %v326_v56, %v325_v57  ;;  %v295_v60 = vadd.f32 %v267_v9, %v771_v35  ;;  %610 = vlog2.f32 %v247_v14 }
 0x155   :  { %v603_v2 = vpop.eup %602  ;;  %v296_v10 = vadd.f32 %v269_v44, %v781_v42 }
 0x156   :  { %v129_v36 = vpop.xlane.xlu1 %128  ;;  %v342_v37 = vadd.f32 %v341_v31, %v327_v0  ;;  %v328_v52 = vsub.f32 %v295_v60, %v312_v4  ;;  %v271_v1 = vmul.f32 0.6931472, %v603_v2  ;;  %v605_v21 = vpop.eup %604 }
 0x157   :  { %v249_v23 = vpop.xlane.xlu0 %248  ;;  %v329_v18 = vsub.f32 %v296_v10, %v313_v30  ;;  %v273_v26 = vmul.f32 0.6931472, %v605_v21  ;;  %v315_v7 = vmul.f32 2.0, %v129_v36 }
 0x158   :  { %v297_v5 = vadd.f32 %v271_v1, %v779_v41  ;;  %v343_v24 = vadd.f32 %v342_v37, %v328_v52 }
 0x159   :  { %v607_v35 = vpop.eup %606  ;;  %v298_v42 = vadd.f32 %v273_v26, %v789_v48 }
 0x15a   :  { %v131_v22 = vpop.xlane.xlu1 %130  ;;  %v275_v28 = vmul.f32 0.6931472, %v607_v35  ;;  %v330_v27 = vsub.f32 %v297_v5, %v314_v8  ;;  %v344_v32 = vadd.f32 %v343_v24, %v329_v18  ;;  %v609_v33 = vpop.eup %608 }
 0x15b   :  { %v251_v19 = vpop.xlane.xlu0 %250  ;;  %v316_v34 = vmul.f32 2.0, %v131_v22  ;;  %v331_v46 = vsub.f32 %v298_v42, %v315_v7  ;;  %v277_v53 = vmul.f32 0.6931472, %v609_v33 }
 0x15c   :  { %612 = vlog2.f32 %v251_v19  ;;  %v345_v13 = vadd.f32 %v344_v32, %v330_v27  ;;  %v299_v41 = vadd.f32 %v275_v28, %v787_v47 }
 0x15d   :  { %614 = vlog2.f32 %v249_v23  ;;  %v300_v50 = vadd.f32 %v277_v53, %v799_v55 }
 0x15e   :  { %v133_v12 = vpop.xlane.xlu1 %132  ;;  %v611_v45 = vpop.eup %610  ;;  %v346_v11 = vadd.f32 %v345_v13, %v331_v46  ;;  %v332_v51 = vsub.f32 %v299_v41, %v316_v34 }
 0x15f   :  { %v253_v29 = vpop.xlane.xlu0 %252  ;;  %v279_v49 = vmul.f32 0.6931472, %v611_v45  ;;  %v317_v25 = vmul.f32 2.0, %v133_v12 }
 0x160   :  { %616 = vlog2.f32 %v253_v29  ;;  %v347_v38 = vadd.f32 %v346_v11, %v332_v51 }
 0x161   :  { %v333_v56 = vsub.f32 %v300_v50, %v317_v25  ;;  %v301_v9 = vadd.f32 %v279_v49, %v797_v54 }
 0x162   :  { %v135_v61 = vpop.xlane.xlu1 %134 }
 0x163   :  { %v255_v43 = vpop.xlane.xlu0 %254  ;;  %v318_v15 = vmul.f32 2.0, %v135_v61  ;;  %v348_v44 = vadd.f32 %v347_v38, %v333_v56  ;;  %v308_v61 = vld [vmem:[#allocation2] sm:$0x1] }
 0x164   :  { %618 = vlog2.f32 %v255_v43 }
 0x165   :  { %v334_v4 = vsub.f32 %v301_v9, %v318_v15 }
 0x166   :  { %v613_v3 = vpop.eup %612  ;;  %v139_v58 = vpop.xlane.xlu1 %138 }
 0x167   :  { %v257_v6 = vpop.xlane.xlu0 %256  ;;  %v615_v48 = vpop.eup %614  ;;  %v283_v47 = vmul.f32 0.6931472, %v613_v3  ;;  %v320_v2 = vmul.f32 2.0, %v139_v58  ;;  %v349_v1 = vadd.f32 %v348_v44, %v334_v4 }
 0x168   :  { %620 = vlog2.f32 %v257_v6  ;;  %v281_v57 = vmul.f32 0.6931472, %v615_v48 }
 0x169   :  { %v303_v60 = vadd.f32 %v283_v47, %v810_v62 }
 0x16a   :  { %v617_v17 = vpop.eup %616  ;;  %v302_v36 = vadd.f32 %v281_v57, %v812_v63  ;;  %v143_v37 = vpop.xlane.xlu1 %142 }
 0x16b   :  { %v259_v59 = vpop.xlane.xlu0 %258  ;;  %v285_v31 = vmul.f32 0.6931472, %v617_v17  ;;  %v336_v10 = vsub.f32 %v303_v60, %v320_v2  ;;  %v322_v54 = vmul.f32 2.0, %v143_v37 }
 0x16c   :  { %622 = vlog2.f32 %v259_v59 }
 0x16d   :  { %v304_v21 = vadd.f32 %v285_v31, %v828_v20 }
 0x16e   :  { %v619_v14 = vpop.eup %618  ;;  %v147_v24 = vpop.xlane.xlu1 %146 }
 0x16f   :  { %v137_v0 = vpop.xlane.xlu0 %136  ;;  %v287_v55 = vmul.f32 0.6931472, %v619_v14  ;;  %v324_v27 = vmul.f32 2.0, %v147_v24 }
 0x170   :  { %v319_v23 = vmul.f32 2.0, %v137_v0 }
 0x171   :  { %v305_v62 = vadd.f32 %v287_v55, %v826_v16 }
 0x172   :  { %v621_v52 = vpop.eup %620  ;;  %v335_v30 = vsub.f32 %v302_v36, %v319_v23 }
 0x173   :  { %v141_v22 = vpop.xlane.xlu0 %140  ;;  %v289_v19 = vmul.f32 0.6931472, %v621_v52  ;;  %v338_v32 = vsub.f32 %v305_v62, %v322_v54 }
 0x174   :  { %v350_v5 = vadd.f32 %v349_v1, %v335_v30  ;;  %v321_v8 = vmul.f32 2.0, %v141_v22 }
 0x175   :  { %v306_v12 = vadd.f32 %v289_v19, %v851_v40 }
 0x176   :  { %v623_v35 = vpop.eup %622  ;;  %v351_v18 = vadd.f32 %v350_v5, %v336_v10  ;;  %v337_v26 = vsub.f32 %v304_v21, %v321_v8 }
 0x177   :  { %v291_v63 = vmul.f32 0.6931472, %v623_v35  ;;  %v145_v28 = vpop.xlane.xlu0 %144 }
 0x178   :  { %v352_v29 = vadd.f32 %v351_v18, %v337_v26  ;;  %v323_v42 = vmul.f32 2.0, %v145_v28 }
 0x179   :  { %v307_v20 = vadd.f32 %v291_v63, %v849_v39 }
 0x17a   :  { %v353_v7 = vadd.f32 %v352_v29, %v338_v32  ;;  %v339_v33 = vsub.f32 %v306_v12, %v323_v42 }
 0x17b   :  { %v340_v13 = vsub.f32 %v307_v20, %v324_v27 }
 0x17c   :  { %v354_v41 = vadd.f32 %v353_v7, %v339_v33 }
 0x17e   :  { %v355_v16 = vadd.f32 %v354_v41, %v340_v13 }
 0x180   :  { %v356_v34 = vrot.slane %v355_v16, 4 }
 0x182   :  { %v357_v43 = vadd.f32 %v356_v34, %v355_v16 }
 0x184   :  { %v358_v45 = vrot.slane %v357_v43, 2 }
 0x186   :  { %v359_v46 = vadd.f32 %v358_v45, %v357_v43 }
 0x188   :  { %v360_v53 = vrot.slane %v359_v46, 1 }
 0x18a   :  { %v361_v11 = vadd.f32 %v360_v53, %v359_v46 }
 0x18c   :  { %v362_v51 = vadd.f32 %v361_v11, %v308_v61 }
 0x18e   :  { %364 = vst.msk [vmem:[#allocation2] sm:$0x1] %vm43_vm0, %v362_v51 }
 0x195   :  { %v497_v6 = vld [vmem:[#allocation2] sm:$0x1] }
 0x1b5   :  { %v496_v40 = vpop.xlane.xlu0 %495 }
 0x1b6   :  { %v498_v39 = vadd.f32 %v497_v6, %v496_v40 }
 0x1b8   :  { %v499_v3 = vmul.f32 0.0078125, %v498_v39 }
 0x1ba   :  { %500 = vst.msk [vmem:[#allocation8] sm:$0x1] %vm43_vm0, %v499_v3 }
 0x1bb   :  { %657 = shalt.err (!%p654_p12)
}
 0x1bc   :  { %s658_s25 = scalar_lea.hbm %s1018_s1, 16 }
 0x1bd   :  { %p659_p13 = scmp.ne.s32.totalorder %s1018_s1, %s658_s25  ;;  %p662_p0 = scmp.lt.u32.totalorder %s658_s25, %s1018_s1 }
 0x1bf   :  { %p664_p1 = pnand %p662_p0, %p659_p13 }
 0x1c1   :  { %667 = shalt.err (!%p664_p1)
}
 0x1c2   :  { %510 = dma.vmem_to_hbm [thread:$0]  %s508_s20, 16, %s1018_s1, [#allocation7]  }
 0x1c3   :  { %670 = dma.done.wait [#allocation7], 16  }
 0x1c4   :  { %671 = vsyncadd [#allocation7], 4294967280 }
 0x1c5   :  { %514 = vsyncpa [#allocation6], 1 }
 0x1c6   :  { %515 = vsyncpa [#allocation7], 1 }

</bundles_post_ra>
